<compile_context>
chip_gen: v5e
topology: v5e:2x2
jax: 0.10.0
libtpu: 0.0.40
codegen_flags: <defaults>
</compile_context>

<pallas_src>
import functools

import jax
import jax.numpy as jnp
import numpy as np
from jax.experimental import pallas as pl
from jax.experimental.pallas import tpu as pltpu


# ----------------------------- math helpers -----------------------------------
def _layernorm(v, g, b, eps=1e-5):
    # v: (R, H) f32, g/b: (1, H) f32 -- biased variance, like torch.nn.LayerNorm
    mu = jnp.mean(v, axis=-1, keepdims=True)
    var = jnp.mean((v - mu) ** 2, axis=-1, keepdims=True)
    return (v - mu) * jax.lax.rsqrt(var + eps) * g + b


def _gelu(x, approximate):
    if approximate:
        # tanh-form GELU: the transcendental lands on the EUP slot instead of a
        # long erf polynomial on the VALUs (largest elementwise tensor in block).
        c = 0.7978845608028654  # sqrt(2/pi)
        return 0.5 * x * (1.0 + jnp.tanh(c * (x + 0.044715 * x * x * x)))
    return 0.5 * x * (1.0 + jax.lax.erf(x * 0.7071067811865476))


# ---------------- kernel 1: LayerNorm1 + Q/K/V projections --------------------
def ln_qkv_kernel(x_ref, g_ref, b_ref, wq_ref, bq_ref, wk_ref, bk_ref,
                  wv_ref, bv_ref, q_ref, k_ref, v_ref, h_sc):
    # Grid: (row_tiles, weight_col_tiles).  LN1 computed once per row tile.
    @pl.when(pl.program_id(1) == 0)
    def _():
        x = x_ref[...].astype(jnp.float32)
        h_sc[...] = _layernorm(x, g_ref[...], b_ref[...]).astype(h_sc.dtype)

    h = h_sc[...]                                               # (TR, H) bf16
    q_ref[...] = (jnp.dot(h, wq_ref[...], preferred_element_type=jnp.float32)
                  + bq_ref[...]).astype(q_ref.dtype)
    k_ref[...] = (jnp.dot(h, wk_ref[...], preferred_element_type=jnp.float32)
                  + bk_ref[...]).astype(k_ref.dtype)
    v_ref[...] = (jnp.dot(h, wv_ref[...], preferred_element_type=jnp.float32)
                  + bv_ref[...]).astype(v_ref.dtype)


# ---------------- kernel 2: attention + fused out-proj + residual -------------
def attn_kernel(x_ref, q_ref, k_ref, v_ref, wo_ref, bo_ref, x1_ref,
                m_sc, l_sc, acc_sc, out_sc, *,
                heads_per_group, head_dim, scale, approx_recip):
    hg = pl.program_id(2)
    kv = pl.program_id(3)
    n_hg = pl.num_programs(2)
    n_kv = pl.num_programs(3)
    hd = head_dim

    @pl.when(kv == 0)
    def _():
        m_sc[...] = jnp.full(m_sc.shape, -jnp.inf, m_sc.dtype)
        l_sc[...] = jnp.zeros(l_sc.shape, l_sc.dtype)
        acc_sc[...] = jnp.zeros(acc_sc.shape, acc_sc.dtype)

    @pl.when(jnp.logical_and(hg == 0, kv == 0))
    def _():
        out_sc[...] = jnp.zeros(out_sc.shape, out_sc.dtype)

    q = q_ref[0]                                                # (Tq,  GW) bf16
    k = k_ref[0]                                                # (Tkv, GW) bf16
    v = v_ref[0]                                                # (Tkv, GW) bf16

    # Online softmax per head; per-head running stats live in VMEM scratch so no
    # large values stay live across grid steps (no vreg spills, no S^2 scores).
    for i in range(heads_per_group):
        qh = q[:, i * hd:(i + 1) * hd]
        kh = k[:, i * hd:(i + 1) * hd]
        vh = v[:, i * hd:(i + 1) * hd]
        s = jax.lax.dot_general(qh, kh, (((1,), (1,)), ((), ())),
                                preferred_element_type=jnp.float32) * scale
        m_prev = m_sc[i]                                        # (Tq, 1) f32
        m_new = jnp.maximum(m_prev, jnp.max(s, axis=-1, keepdims=True))
        alpha = jnp.exp(m_prev - m_new)
        p = jnp.exp(s - m_new)
        l_sc[i] = alpha * l_sc[i] + jnp.sum(p, axis=-1, keepdims=True)
        acc_sc[i] = alpha * acc_sc[i] + jnp.dot(
            p.astype(jnp.bfloat16), vh, preferred_element_type=jnp.float32)
        m_sc[i] = m_new

    # Last KV chunk of this head group: normalise and immediately fold this
    # group's rows of the out-projection into the (Tq, H) accumulator -- no
    # head-major context layout / transpose is ever materialised.
    @pl.when(kv == n_kv - 1)
    def _():
        for i in range(heads_per_group):
            if approx_recip:
                inv_l = pl.reciprocal(l_sc[i], approx=True)     # EUP reciprocal
            else:
                inv_l = 1.0 / l_sc[i]
            ctx_h = (acc_sc[i] * inv_l).astype(jnp.bfloat16)    # (Tq, hd)
            out_sc[...] += jnp.dot(ctx_h, wo_ref[i * hd:(i + 1) * hd, :],
                                   preferred_element_type=jnp.float32)

        @pl.when(hg == n_hg - 1)
        def _():
            # Fused first residual: x1 = x + attn_out (f32).
            x1_ref[0] = (x_ref[0].astype(jnp.float32) + out_sc[...]
                         + bo_ref[...]).astype(x1_ref.dtype)
    # TODO(synk): optional attention mask (mask=None path only is implemented).


# ---------------- kernel 3: LN2 + FFN (weight-tiled over I) + residual --------
def ffn_kernel(x1_ref, g2_ref, b2_ref, w1_ref, b1_ref, w2_ref, b2f_ref, o_ref,
               h2_sc, acc_sc, *, approximate_gelu):
    ii = pl.program_id(1)

    @pl.when(ii == 0)
    def _():
        x1 = x1_ref[...].astype(jnp.float32)
        h2_sc[...] = _layernorm(x1, g2_ref[...], b2_ref[...]).astype(h2_sc.dtype)
        acc_sc[...] = jnp.zeros(acc_sc.shape, acc_sc.dtype)

    ff = jnp.dot(h2_sc[...], w1_ref[...],
                 preferred_element_type=jnp.float32) + b1_ref[...]
    ff = _gelu(ff, approximate_gelu)
    acc_sc[...] += jnp.dot(ff.astype(jnp.bfloat16), w2_ref[...],
                           preferred_element_type=jnp.float32)

    @pl.when(ii == pl.num_programs(1) - 1)
    def _():
        o_ref[...] = (x1_ref[...].astype(jnp.float32) + acc_sc[...]
                      + b2f_ref[...]).astype(o_ref.dtype)


# ---------------- tiling / budgeting helpers ----------------------------------
def _divisor_tile(n, candidates):
    for t in candidates:
        if n % t == 0:
            return t
    return n


def _row_tile(rows, H):
    # Biggest row tile whose (TR, H) f32 block stays within ~4 MiB, so the f32
    # accumulator / LN scratch leave VMEM headroom; grows to 1024 at moderate H.
    cands = (1024, 512, 256, 128, 64, 32, 16, 8)
    for t in cands:
        if rows % t == 0 and t * H * 4 <= (4 << 20):
            return t
    return _divisor_tile(rows, cands)


def _feature_tile(n, bytes_per_col, budget_bytes):
    # Tile over an output-feature axis; tile must be a multiple of 128 (lane-dense
    # blocks / unmasked stores) or the full extent.
    if n % 128 != 0:
        return n
    divs = [d for d in range(128, n + 1, 128) if n % d == 0]
    fits = [d for d in divs if d * bytes_per_col <= budget_bytes]
    return max(fits) if fits else min(divs)


def _head_group_width(H, hd):
    # Column width of one attention head group: smallest multiple of hd that is
    # lane-aligned (multiple of 128) and divides H; falls back to all heads (== H)
    # for small models so BlockSpec tiling rules always hold.
    if H % 128 == 0:
        g = hd
        while g % 128 != 0 and g < H:
            g += hd
        if g % 128 == 0 and H % g == 0:
            return g
    return H


def _vmem_limit_bytes():
    # Generation-aware scoped-VMEM request: ~80% of physical, capped at 110 MiB
    # (v5e/v6e: 128 MiB physical; v7x: 64 MiB per TensorCore).
    cap = None
    try:
        cap = int(pltpu.get_tpu_info().vmem_capacity_bytes)
    except Exception:
        cap = None
    if cap is None:
        try:
            kind = jax.devices()[0].device_kind.lower()
            cap = (64 << 20) if "v7" in kind else (128 << 20)
        except Exception:
            cap = 64 << 20
    return int(min(int(cap * 0.8), 110 << 20))


# ---------------- wrapper ------------------------------------------------------
def transformer_block(x, params, *, num_heads, approximate_gelu=True,
                      approx_softmax_recip=True):
    B, S, H = x.shape
    hd = H // num_heads
    I = params["w1"].shape[1]
    rows = B * S
    out_dtype = x.dtype
    bf16, f32 = jnp.bfloat16, jnp.float32

    TR = _row_tile(rows, H)
    n_rt = rows // TR
    vmem_limit = _vmem_limit_bytes()

    # Weights -> bf16 once (MXU operands, half the VMEM); biases & LN params f32.
    wq = params["wq"].astype(bf16); bq = params["bq"].astype(f32)
    wk = params["wk"].astype(bf16); bk = params["bk"].astype(f32)
    wv = params["wv"].astype(bf16); bv = params["bv"].astype(f32)
    wo = params["wo"].astype(bf16); bo = params["bo"].astype(f32)
    w1 = params["w1"].astype(bf16); b1 = params["b1"].astype(f32)
    w2 = params["w2"].astype(bf16); b2 = params["b2"].astype(f32)
    ln1g = params["ln1_g"].astype(f32); ln1b = params["ln1_b"].astype(f32)
    ln2g = params["ln2_g"].astype(f32); ln2b = params["ln2_b"].astype(f32)

    x2d = x.reshape(rows, H)

    # ---- kernel 1: LN1 + Q/K/V projections (row-tiled, weight-column-tiled) ---
    TC = _feature_tile(H, bytes_per_col=3 * H * 2 * 2, budget_bytes=24 << 20)
    n_ct = H // TC
    q2d, k2d, v2d = pl.pallas_call(
        ln_qkv_kernel,
        out_shape=[jax.ShapeDtypeStruct((rows, H), bf16) for _ in range(3)],
        grid_spec=pltpu.PrefetchScalarGridSpec(
            num_scalar_prefetch=0,
            grid=(n_rt, n_ct),
            in_specs=[
                pl.BlockSpec((TR, H), lambda r, c: (r, 0)),     # x rows
                pl.BlockSpec((1, H), lambda r, c: (0, 0)),      # ln1 gamma
                pl.BlockSpec((1, H), lambda r, c: (0, 0)),      # ln1 beta
                pl.BlockSpec((H, TC), lambda r, c: (0, c)),     # wq cols
                pl.BlockSpec((1, TC), lambda r, c: (0, c)),     # bq
                pl.BlockSpec((H, TC), lambda r, c: (0, c)),     # wk cols
                pl.BlockSpec((1, TC), lambda r, c: (0, c)),     # bk
                pl.BlockSpec((H, TC), lambda r, c: (0, c)),     # wv cols
                pl.BlockSpec((1, TC), lambda r, c: (0, c)),     # bv
            ],
            out_specs=[pl.BlockSpec((TR, TC), lambda r, c: (r, c))
                       for _ in range(3)],
            scratch_shapes=[pltpu.VMEM((TR, H), bf16)],         # cached LN1 rows
        ),
        compiler_params=pltpu.CompilerParams(
            dimension_semantics=("parallel", "arbitrary"),
            vmem_limit_bytes=vmem_limit,
        ),
        cost_estimate=pl.CostEstimate(
            flops=int(2 * rows * H * 3 * H),
            transcendentals=int(rows),
            bytes_accessed=int(rows * H * 4 + 3 * H * H * 2 + 3 * rows * H * 2),
        ),
    )(x2d, ln1g, ln1b, wq, bq, wk, bk, wv, bv)

    # ---- kernel 2: flash attention + fused out-proj + residual ----------------
    GW = _head_group_width(H, hd)
    hpg = GW // hd
    n_hg = H // GW
    Tq = _divisor_tile(S, (256, 128, 64, 32, 16, 8))
    Tkv = _divisor_tile(S, (512, 256, 128, 64, 32, 16, 8))
    n_q, n_kv = S // Tq, S // Tkv

    q3d = q2d.reshape(B, S, H)
    k3d = k2d.reshape(B, S, H)
    v3d = v2d.reshape(B, S, H)

    x1 = pl.pallas_call(
        functools.partial(attn_kernel, heads_per_group=hpg, head_dim=hd,
                          scale=float(hd) ** -0.5,
                          approx_recip=approx_softmax_recip),
        out_shape=jax.ShapeDtypeStruct((B, S, H), f32),
        grid_spec=pltpu.PrefetchScalarGridSpec(
            num_scalar_prefetch=0,
            grid=(B, n_q, n_hg, n_kv),
            in_specs=[
                pl.BlockSpec((1, Tq, H), lambda b, q, h, k: (b, q, 0)),    # x
                pl.BlockSpec((1, Tq, GW), lambda b, q, h, k: (b, q, h)),   # Q
                pl.BlockSpec((1, Tkv, GW), lambda b, q, h, k: (b, k, h)),  # K
                pl.BlockSpec((1, Tkv, GW), lambda b, q, h, k: (b, k, h)),  # V
                pl.BlockSpec((GW, H), lambda b, q, h, k: (h, 0)),          # Wo rows
                pl.BlockSpec((1, H), lambda b, q, h, k: (0, 0)),           # bo
            ],
            out_specs=pl.BlockSpec((1, Tq, H), lambda b, q, h, k: (b, q, 0)),
            scratch_shapes=[
                pltpu.VMEM((hpg, Tq, 1), f32),    # running max m
                pltpu.VMEM((hpg, Tq, 1), f32),    # running denom l
                pltpu.VMEM((hpg, Tq, hd), f32),   # per-head ctx accumulator
                pltpu.VMEM((Tq, H), f32),         # fused out-proj accumulator
            ],
        ),
        compiler_params=pltpu.CompilerParams(
            dimension_semantics=("parallel", "parallel", "arbitrary", "arbitrary"),
            vmem_limit_bytes=vmem_limit,
        ),
        cost_estimate=pl.CostEstimate(
            flops=int(4 * B * num_heads * S * S * hd + 2 * B * S * H * H),
            transcendentals=int(B * num_heads * S * S),
            bytes_accessed=int(B * S * H * (4 + 6 + 4) + B * n_q * H * H * 2),
        ),
    )(x, q3d, k3d, v3d, wo, bo)

    # ---- kernel 3: LN2 + FFN(GELU) + residual (FFN weight-tiled over I) -------
    TI = _feature_tile(I, bytes_per_col=8 * H + 4 * TR, budget_bytes=24 << 20)
    n_it = I // TI
    x1_2d = x1.reshape(rows, H)

    out2d = pl.pallas_call(
        functools.partial(ffn_kernel, approximate_gelu=approximate_gelu),
        out_shape=jax.ShapeDtypeStruct((rows, H), out_dtype),
        grid_spec=pltpu.PrefetchScalarGridSpec(
            num_scalar_prefetch=0,
            grid=(n_rt, n_it),
            in_specs=[
                pl.BlockSpec((TR, H), lambda r, i: (r, 0)),     # x1 (residual + LN2)
                pl.BlockSpec((1, H), lambda r, i: (0, 0)),      # ln2 gamma
                pl.BlockSpec((1, H), lambda r, i: (0, 0)),      # ln2 beta
                pl.BlockSpec((H, TI), lambda r, i: (0, i)),     # fc1 weight cols
                pl.BlockSpec((1, TI), lambda r, i: (0, i)),     # fc1 bias
                pl.BlockSpec((TI, H), lambda r, i: (i, 0)),     # fc2 weight rows
                pl.BlockSpec((1, H), lambda r, i: (0, 0)),      # fc2 bias
            ],
            out_specs=pl.BlockSpec((TR, H), lambda r, i: (r, 0)),
            scratch_shapes=[
                pltpu.VMEM((TR, H), bf16),                      # cached LN2 rows
                pltpu.VMEM((TR, H), f32),                       # FC2 accumulator
            ],
        ),
        compiler_params=pltpu.CompilerParams(
            dimension_semantics=("parallel", "arbitrary"),
            vmem_limit_bytes=vmem_limit,
        ),
        cost_estimate=pl.CostEstimate(
            flops=int(4 * rows * H * I),
            transcendentals=int(rows * (I + 1)),
            bytes_accessed=int(rows * H * 8 + 4 * H * I),
        ),
    )(x1_2d, ln2g, ln2b, w1, b1, w2, b2)

    return out2d.reshape(B, S, H)


# ---------------- pure-JAX f32 reference (torch semantics: exact GELU) --------
def reference_block(x, params, *, num_heads):
    B, S, H = x.shape
    hd = H // num_heads

    def ln(v, g, b):
        mu = jnp.mean(v, axis=-1, keepdims=True)
        var = jnp.mean((v - mu) ** 2, axis=-1, keepdims=True)
        return (v - mu) / jnp.sqrt(var + 1e-5) * g + b

    h = ln(x, params["ln1_g"], params["ln1_b"])
    q = h @ params["wq"] + params["bq"]
    k = h @ params["wk"] + params["bk"]
    v = h @ params["wv"] + params["bv"]
    q = q.reshape(B, S, num_heads, hd).transpose(0, 2, 1, 3)
    k = k.reshape(B, S, num_heads, hd).transpose(0, 2, 1, 3)
    v = v.reshape(B, S, num_heads, hd).transpose(0, 2, 1, 3)
    scores = jnp.einsum("bnqd,bnkd->bnqk", q, k) * (hd ** -0.5)
    attn = jax.nn.softmax(scores, axis=-1)
    ctx = jnp.einsum("bnqk,bnkd->bnqd", attn, v).transpose(0, 2, 1, 3).reshape(B, S, H)
    x1 = x + ctx @ params["wo"] + params["bo"]
    h2 = ln(x1, params["ln2_g"], params["ln2_b"])
    ff = jax.nn.gelu(h2 @ params["w1"] + params["b1"], approximate=False)
    ff = ff @ params["w2"] + params["b2"]
    return x1 + ff


if __name__ == "__main__":
    B, S, H, NH, I = 2, 8, 32, 4, 64

    key = jax.random.PRNGKey(0)
    keys = jax.random.split(key, 16)

    def w(k, shape, scale=0.05):
        return jax.random.normal(k, shape, dtype=jnp.float32) * scale

    params = {
        "ln1_g": jnp.ones((1, H), jnp.float32),
        "ln1_b": jnp.zeros((1, H), jnp.float32),
        "wq": w(keys[0], (H, H)), "bq": w(keys[1], (1, H)),
        "wk": w(keys[2], (H, H)), "bk": w(keys[3], (1, H)),
        "wv": w(keys[4], (H, H)), "bv": w(keys[5], (1, H)),
        "wo": w(keys[6], (H, H)), "bo": w(keys[7], (1, H)),
        "ln2_g": jnp.ones((1, H), jnp.float32),
        "ln2_b": jnp.zeros((1, H), jnp.float32),
        "w1": w(keys[8], (H, I)), "b1": w(keys[9], (1, I)),
        "w2": w(keys[10], (I, H)), "b2": w(keys[11], (1, H)),
    }

    x = jax.random.normal(keys[12], (B, S, H), dtype=jnp.float32)

    out = jax.block_until_ready(transformer_block(x, params, num_heads=NH))
    ref = jax.block_until_ready(reference_block(x, params, num_heads=NH))

    # bf16 MXU operands (f32 accumulation), tanh-GELU and approx-reciprocal softmax
    # normalisation -> compare against exact f32 reference with bf16-appropriate
    # tolerance.
    np.testing.assert_allclose(np.asarray(out), np.asarray(ref), atol=3e-2, rtol=3e-2)

    print("KERNEL_OK")
</pallas_src>

<mosaic_0001>
module attributes {stable_mosaic.version = 11 : i64} {
  func.func @ln_qkv_kernel(%arg0: i32, %arg1: i32, %arg2: memref<16x32xf32, #tpu.memory_space<vmem>>, %arg3: memref<1x32xf32, #tpu.memory_space<vmem>>, %arg4: memref<1x32xf32, #tpu.memory_space<vmem>>, %arg5: memref<32x32xbf16, #tpu.memory_space<vmem>>, %arg6: memref<1x32xf32, #tpu.memory_space<vmem>>, %arg7: memref<32x32xbf16, #tpu.memory_space<vmem>>, %arg8: memref<1x32xf32, #tpu.memory_space<vmem>>, %arg9: memref<32x32xbf16, #tpu.memory_space<vmem>>, %arg10: memref<1x32xf32, #tpu.memory_space<vmem>>, %arg11: memref<16x32xbf16, #tpu.memory_space<vmem>>, %arg12: memref<16x32xbf16, #tpu.memory_space<vmem>>, %arg13: memref<16x32xbf16, #tpu.memory_space<vmem>>, %arg14: memref<16x32xbf16, #tpu.memory_space<vmem>>) attributes {dimension_semantics = [#tpu.dimension_semantics<parallel>, #tpu.dimension_semantics<arbitrary>], iteration_bounds = array<i64: 1, 1>, scalar_prefetch = 0 : i64, scratch_operands = 1 : i64, tpu.core_type = #tpu.core_type<tc>, window_params = [{transform_indices = @transform_0, window_bounds = array<i64: 16, 32>}, {pipeline_mode = #tpu.pipeline_mode<synchronous>, transform_indices = @transform_1, window_bounds = array<i64: 1, 32>}, {pipeline_mode = #tpu.pipeline_mode<synchronous>, transform_indices = @transform_2, window_bounds = array<i64: 1, 32>}, {transform_indices = @transform_3, window_bounds = array<i64: 32, 32>}, {transform_indices = @transform_4, window_bounds = array<i64: 1, 32>}, {transform_indices = @transform_5, window_bounds = array<i64: 32, 32>}, {transform_indices = @transform_6, window_bounds = array<i64: 1, 32>}, {transform_indices = @transform_7, window_bounds = array<i64: 32, 32>}, {transform_indices = @transform_8, window_bounds = array<i64: 1, 32>}, {transform_indices = @transform_9, window_bounds = array<i64: 16, 32>}, {transform_indices = @transform_10, window_bounds = array<i64: 16, 32>}, {transform_indices = @transform_11, window_bounds = array<i64: 16, 32>}]} {
    %c0_i32 = arith.constant 0 : i32
    %0 = arith.cmpi eq, %arg1, %c0_i32 : i32
    %1 = arith.extui %0 : i1 to i32
    %c0_i32_0 = arith.constant 0 : i32
    %2 = arith.cmpi ne, %1, %c0_i32_0 : i32
    scf.if %2 {
      %c0_22 = arith.constant 0 : index
      %c0_23 = arith.constant 0 : index
      %25 = vector.load %arg2[%c0_22, %c0_23] : memref<16x32xf32, #tpu.memory_space<vmem>>, vector<16x32xf32>
      %c0_24 = arith.constant 0 : index
      %c0_25 = arith.constant 0 : index
      %26 = vector.load %arg3[%c0_24, %c0_25] : memref<1x32xf32, #tpu.memory_space<vmem>>, vector<1x32xf32>
      %c0_26 = arith.constant 0 : index
      %c0_27 = arith.constant 0 : index
      %27 = vector.load %arg4[%c0_26, %c0_27] : memref<1x32xf32, #tpu.memory_space<vmem>>, vector<1x32xf32>
      %cst_28 = arith.constant dense<0.000000e+00> : vector<16xf32>
      %28 = vector.multi_reduction <add>, %25, %cst_28 [1] : vector<16x32xf32> to vector<16xf32>
      %29 = vector.shape_cast %28 : vector<16xf32> to vector<16x1xf32>
      %cst_29 = arith.constant 3.200000e+01 : f32
      %30 = vector.broadcast %cst_29 : f32 to vector<16x1xf32>
      %31 = arith.divf %29, %30 : vector<16x1xf32>
      %32 = vector.broadcast %31 : vector<16x1xf32> to vector<16x32xf32>
      %33 = arith.subf %25, %32 : vector<16x32xf32>
      %34 = arith.mulf %33, %33 : vector<16x32xf32>
      %cst_30 = arith.constant dense<0.000000e+00> : vector<16xf32>
      %35 = vector.multi_reduction <add>, %34, %cst_30 [1] : vector<16x32xf32> to vector<16xf32>
      %36 = vector.shape_cast %35 : vector<16xf32> to vector<16x1xf32>
      %cst_31 = arith.constant 3.200000e+01 : f32
      %37 = vector.broadcast %cst_31 : f32 to vector<16x1xf32>
      %38 = arith.divf %36, %37 : vector<16x1xf32>
      %39 = vector.broadcast %31 : vector<16x1xf32> to vector<16x32xf32>
      %40 = arith.subf %25, %39 : vector<16x32xf32>
      %cst_32 = arith.constant 9.99999974E-6 : f32
      %41 = vector.broadcast %cst_32 : f32 to vector<16x1xf32>
      %42 = arith.addf %38, %41 : vector<16x1xf32>
      %43 = math.rsqrt %42 : vector<16x1xf32>
      %44 = vector.broadcast %43 : vector<16x1xf32> to vector<16x32xf32>
      %45 = arith.mulf %40, %44 : vector<16x32xf32>
      %46 = vector.broadcast %26 : vector<1x32xf32> to vector<16x32xf32>
      %47 = arith.mulf %45, %46 : vector<16x32xf32>
      %48 = vector.broadcast %27 : vector<1x32xf32> to vector<16x32xf32>
      %49 = arith.addf %47, %48 : vector<16x32xf32>
      %50 = arith.truncf %49 : vector<16x32xf32> to vector<16x32xbf16>
      %c0_33 = arith.constant 0 : index
      %c0_34 = arith.constant 0 : index
      %51 = vector.load %arg14[%c0_33, %c0_34] : memref<16x32xbf16, #tpu.memory_space<vmem>>, vector<16x32xbf16>
      tpu.vector_store %arg14[%c0_33, %c0_34], %50 {strides = array<i32>} : memref<16x32xbf16, #tpu.memory_space<vmem>>, vector<16x32xbf16>,
    } else {
    }
    %c0 = arith.constant 0 : index
    %c0_1 = arith.constant 0 : index
    %3 = vector.load %arg14[%c0, %c0_1] : memref<16x32xbf16, #tpu.memory_space<vmem>>, vector<16x32xbf16>
    %c0_2 = arith.constant 0 : index
    %c0_3 = arith.constant 0 : index
    %4 = vector.load %arg5[%c0_2, %c0_3] : memref<32x32xbf16, #tpu.memory_space<vmem>>, vector<32x32xbf16>
    %cst = arith.constant dense<0.000000e+00> : vector<16x32xf32>
    %5 = tpu.matmul %3, %4, %cst {dimension_numbers = #tpu.dot_dimension_numbers<[1], [0], [0], [1], [0, 0, 1, 1], [], []>} : vector<16x32xbf16>, vector<32x32xbf16>, vector<16x32xf32> -> vector<16x32xf32>
    %c0_4 = arith.constant 0 : index
    %c0_5 = arith.constant 0 : index
    %6 = vector.load %arg6[%c0_4, %c0_5] : memref<1x32xf32, #tpu.memory_space<vmem>>, vector<1x32xf32>
    %7 = vector.broadcast %6 : vector<1x32xf32> to vector<16x32xf32>
    %8 = arith.addf %5, %7 : vector<16x32xf32>
    %9 = arith.truncf %8 : vector<16x32xf32> to vector<16x32xbf16>
    %c0_6 = arith.constant 0 : index
    %c0_7 = arith.constant 0 : index
    %10 = vector.load %arg11[%c0_6, %c0_7] : memref<16x32xbf16, #tpu.memory_space<vmem>>, vector<16x32xbf16>
    tpu.vector_store %arg11[%c0_6, %c0_7], %9 {strides = array<i32>} : memref<16x32xbf16, #tpu.memory_space<vmem>>, vector<16x32xbf16>,
    %c0_8 = arith.constant 0 : index
    %c0_9 = arith.constant 0 : index
    %11 = vector.load %arg7[%c0_8, %c0_9] : memref<32x32xbf16, #tpu.memory_space<vmem>>, vector<32x32xbf16>
    %cst_10 = arith.constant dense<0.000000e+00> : vector<16x32xf32>
    %12 = tpu.matmul %3, %11, %cst_10 {dimension_numbers = #tpu.dot_dimension_numbers<[1], [0], [0], [1], [0, 0, 1, 1], [], []>} : vector<16x32xbf16>, vector<32x32xbf16>, vector<16x32xf32> -> vector<16x32xf32>
    %c0_11 = arith.constant 0 : index
    %c0_12 = arith.constant 0 : index
    %13 = vector.load %arg8[%c0_11, %c0_12] : memref<1x32xf32, #tpu.memory_space<vmem>>, vector<1x32xf32>
    %14 = vector.broadcast %13 : vector<1x32xf32> to vector<16x32xf32>
    %15 = arith.addf %12, %14 : vector<16x32xf32>
    %16 = arith.truncf %15 : vector<16x32xf32> to vector<16x32xbf16>
    %c0_13 = arith.constant 0 : index
    %c0_14 = arith.constant 0 : index
    %17 = vector.load %arg12[%c0_13, %c0_14] : memref<16x32xbf16, #tpu.memory_space<vmem>>, vector<16x32xbf16>
    tpu.vector_store %arg12[%c0_13, %c0_14], %16 {strides = array<i32>} : memref<16x32xbf16, #tpu.memory_space<vmem>>, vector<16x32xbf16>,
    %c0_15 = arith.constant 0 : index
    %c0_16 = arith.constant 0 : index
    %18 = vector.load %arg9[%c0_15, %c0_16] : memref<32x32xbf16, #tpu.memory_space<vmem>>, vector<32x32xbf16>
    %cst_17 = arith.constant dense<0.000000e+00> : vector<16x32xf32>
    %19 = tpu.matmul %3, %18, %cst_17 {dimension_numbers = #tpu.dot_dimension_numbers<[1], [0], [0], [1], [0, 0, 1, 1], [], []>} : vector<16x32xbf16>, vector<32x32xbf16>, vector<16x32xf32> -> vector<16x32xf32>
    %c0_18 = arith.constant 0 : index
    %c0_19 = arith.constant 0 : index
    %20 = vector.load %arg10[%c0_18, %c0_19] : memref<1x32xf32, #tpu.memory_space<vmem>>, vector<1x32xf32>
    %21 = vector.broadcast %20 : vector<1x32xf32> to vector<16x32xf32>
    %22 = arith.addf %19, %21 : vector<16x32xf32>
    %23 = arith.truncf %22 : vector<16x32xf32> to vector<16x32xbf16>
    %c0_20 = arith.constant 0 : index
    %c0_21 = arith.constant 0 : index
    %24 = vector.load %arg13[%c0_20, %c0_21] : memref<16x32xbf16, #tpu.memory_space<vmem>>, vector<16x32xbf16>
    tpu.vector_store %arg13[%c0_20, %c0_21], %23 {strides = array<i32>} : memref<16x32xbf16, #tpu.memory_space<vmem>>, vector<16x32xbf16>,
    return
  }
  func.func @transform_0(%arg0: i32, %arg1: i32) -> (i32, i32) {
    %c0_i32 = arith.constant 0 : i32
    %c0_i32_0 = arith.constant 0 : i32
    return %arg0, %c0_i32 : i32, i32
  }
  func.func @transform_1(%arg0: i32, %arg1: i32) -> (i32, i32) {
    %c0_i32 = arith.constant 0 : i32
    %c0_i32_0 = arith.constant 0 : i32
    %c0_i32_1 = arith.constant 0 : i32
    return %c0_i32, %c0_i32_0 : i32, i32
  }
  func.func @transform_2(%arg0: i32, %arg1: i32) -> (i32, i32) {
    %c0_i32 = arith.constant 0 : i32
    %c0_i32_0 = arith.constant 0 : i32
    %c0_i32_1 = arith.constant 0 : i32
    return %c0_i32, %c0_i32_0 : i32, i32
  }
  func.func @transform_3(%arg0: i32, %arg1: i32) -> (i32, i32) {
    %c0_i32 = arith.constant 0 : i32
    %c0_i32_0 = arith.constant 0 : i32
    return %c0_i32, %arg1 : i32, i32
  }
  func.func @transform_4(%arg0: i32, %arg1: i32) -> (i32, i32) {
    %c0_i32 = arith.constant 0 : i32
    %c0_i32_0 = arith.constant 0 : i32
    return %c0_i32, %arg1 : i32, i32
  }
  func.func @transform_5(%arg0: i32, %arg1: i32) -> (i32, i32) {
    %c0_i32 = arith.constant 0 : i32
    %c0_i32_0 = arith.constant 0 : i32
    return %c0_i32, %arg1 : i32, i32
  }
  func.func @transform_6(%arg0: i32, %arg1: i32) -> (i32, i32) {
    %c0_i32 = arith.constant 0 : i32
    %c0_i32_0 = arith.constant 0 : i32
    return %c0_i32, %arg1 : i32, i32
  }
  func.func @transform_7(%arg0: i32, %arg1: i32) -> (i32, i32) {
    %c0_i32 = arith.constant 0 : i32
    %c0_i32_0 = arith.constant 0 : i32
    return %c0_i32, %arg1 : i32, i32
  }
  func.func @transform_8(%arg0: i32, %arg1: i32) -> (i32, i32) {
    %c0_i32 = arith.constant 0 : i32
    %c0_i32_0 = arith.constant 0 : i32
    return %c0_i32, %arg1 : i32, i32
  }
  func.func @transform_9(%arg0: i32, %arg1: i32) -> (i32, i32) {
    %c0_i32 = arith.constant 0 : i32
    return %arg0, %arg1 : i32, i32
  }
  func.func @transform_10(%arg0: i32, %arg1: i32) -> (i32, i32) {
    %c0_i32 = arith.constant 0 : i32
    return %arg0, %arg1 : i32, i32
  }
  func.func @transform_11(%arg0: i32, %arg1: i32) -> (i32, i32) {
    %c0_i32 = arith.constant 0 : i32
    return %arg0, %arg1 : i32, i32
  }
}

</mosaic_0001>

<bundles_post_ra>
// kernel: tpu_custom_call.1
= control target key start
LH: loop header
LB: loop body
LE: loop exit
PB: predicated region body
PF: predicated region fallthrough
CT: control target
= control target key end

     0   :  { %17 = vsyncpa [#allocation4], 0  ;;  %s777_s0 = inlined_call_operand.hbm [shape: f32[16,32], index: 0, kind: input, shape index: {}]   ;;  %s778_s1 = inlined_call_operand.hbm [shape: f32[1,32], index: 1, kind: input, shape index: {}]   ;;  %s779_s2 = inlined_call_operand.vmem [shape: f32[1,32], index: 2, kind: input, shape index: {}]   ;;  %s780_s3 = inlined_call_operand.hbm [shape: bf16[32,32], index: 3, kind: input, shape index: {}]   ;;  %s781_s4 = inlined_call_operand.vmem [shape: f32[1,32], index: 4, kind: input, shape index: {}]   ;;  %s782_s5 = inlined_call_operand.hbm [shape: bf16[32,32], index: 5, kind: input, shape index: {}]   ;;  %s783_s6 = inlined_call_operand.vmem [shape: f32[1,32], index: 6, kind: input, shape index: {}]   ;;  %s784_s7 = inlined_call_operand.hbm [shape: bf16[32,32], index: 7, kind: input, shape index: {}]   ;;  %s785_s8 = inlined_call_operand.vmem [shape: f32[1,32], index: 8, kind: input, shape index: {}]   ;;  %s786_s9 = inlined_call_operand.hbm [shape: bf16[16,32], index: 9, kind: output, shape index: {0}]   ;;  %s787_s10 = inlined_call_operand.hbm [shape: bf16[16,32], index: 10, kind: output, shape index: {1}]   ;;  %s788_s11 = inlined_call_operand.hbm [shape: bf16[16,32], index: 11, kind: output, shape index: {2}]  }
   0x1   :  { %18 = vsyncpa [#allocation7], 0 }
   0x2   :  { %19 = vsyncpa [#allocation10], 0 }
   0x3   :  { %20 = vsyncpa [#allocation5], 0  ;;  %s40_s19 = sshll.u32 %s778_s1, 4  ;;  %s41_s19 = int_to_ptr.hbm [resolvable:$true] %s40_s19 }
   0x4   :  { %21 = vsyncpa [#allocation14], 0  ;;  %s635_s20 = smov [#allocation6]   ;;  %s67_s24 = sshll.u32 %s782_s5, 4  ;;  %s68_s24 = int_to_ptr.hbm [resolvable:$true] %s67_s24 }
   0x5   :  { %s42_s21 = sshll.u32 %s635_s20, 4  ;;  %s636_s25 = smov [#allocation9]   ;;  %s43_s21 = int_to_ptr.vmem [resolvable:$true] %s42_s21 }
   0x6   :  { %45 = dma.hbm_to_vmem [thread:$0]  %s41_s19, 16, %s43_s21, [#allocation7]  }
   0x7   :  { %s69_s26 = sshll.u32 %s636_s25, 4  ;;  %s26_s29 = sshll.u32 %s777_s0, 4  ;;  %s70_s26 = int_to_ptr.vmem [resolvable:$true] %s69_s26  ;;  %s27_s29 = int_to_ptr.hbm [resolvable:$true] %s26_s29 }
   0x8   :  { %s637_s1 = smov 64   ;;  %s638_s30 = smov 4  }
   0x9   :  { %75 = dma.hbm_to_vmem [thread:$0]  %s68_s24, 256, %s70_s26, [#allocation10], %s637_s1, %s637_s1, %s638_s30  }
   0xa   :  { %s639_s12 = smov [#allocation3]   ;;  %s52_s15 = sshll.u32 %s780_s3, 4  ;;  %s53_s15 = int_to_ptr.hbm [resolvable:$true] %s52_s15 }
   0xb   :  { %s28_s13 = sshll.u32 %s639_s12, 4  ;;  %s640_s16 = smov 128   ;;  %s29_s13 = int_to_ptr.vmem [resolvable:$true] %s28_s13 }
   0xc   :  { %s641_s17 = smov 8   ;;  %s642_s0 = smov [#allocation8]  }
   0xd   :  { %34 = dma.hbm_to_vmem [thread:$0]  %s27_s29, 256, %s29_s13, [#allocation4], %s640_s16, %s640_s16, %s641_s17  }
   0xe   :  { %s54_s18 = sshll.u32 %s642_s0, 4  ;;  %s82_s21 = sshll.u32 %s784_s7, 4  ;;  %s55_s18 = int_to_ptr.vmem [resolvable:$true] %s54_s18  ;;  %s83_s21 = int_to_ptr.hbm [resolvable:$true] %s82_s21 }
   0xf   :  { %60 = dma.hbm_to_vmem [thread:$0]  %s53_s15, 256, %s55_s18, [#allocation7], %s637_s1, %s637_s1, %s638_s30  }
  0x10   :  { %s643_s22 = smov [#allocation11]  }
  0x11   :  { %s84_s23 = sshll.u32 %s643_s22, 4  ;;  %s85_s23 = int_to_ptr.vmem [resolvable:$true] %s84_s23 }
  0x12   :  { %90 = dma.hbm_to_vmem [thread:$0]  %s83_s21, 256, %s85_s23, [#allocation10], %s637_s1, %s637_s1, %s638_s30  }
  0x13   :  { %625 = dma.done.wait [#allocation4], 256  }
  0x14   :  { %626 = vsyncadd [#allocation4], 4294967040 }
  0x15   :  { %627 = dma.done.wait [#allocation7], 272  }
  0x16   :  { %628 = vsyncadd [#allocation7], 4294967024 }
  0x17   :  { %629 = dma.done.wait [#allocation10], 512  }
  0x18   :  { %630 = vsyncadd [#allocation10], 4294966784  ;;  %vm122_vm0 = vcmask 261120   ;;  %v118_v0 = vld [vmem:[#allocation3] sm:$0xff]  ;;  %v119_v2 = vld [vmem:[#allocation3 + $0x8] sm:$0xff]  ;;  %v644_v4 = vmov 32.0  }
  0x19   :  { %v123_v1 = vsel %vm122_vm0, %v118_v0, 0.0  ;;  %v126_v3 = vsel %vm122_vm0, %v119_v2, 0.0  ;;  %427 = vrcp.f32 %v644_v4  ;;  %v404_v24 = vld [vmem:[#allocation8 + $0x8] sm:$0xff]  ;;  %v406_v25 = vld [vmem:[#allocation9 + $0x8] sm:$0xff]  ;;  %v403_v29 = vld [vmem:[#allocation8] sm:$0xff]  ;;  %vm186_vm6 = vcmask 257024  }
  0x1a   :  { %124 = vadd.xlane.f32.xlu0 %v123_v1  ;;  %v408_v26 = vld [vmem:[#allocation11 + $0x8] sm:$0xff]  ;;  %226 = vmatpush.bf16.msra.mxu0 %v404_v24  ;;  %v405_v30 = vld [vmem:[#allocation9] sm:$0xff]  ;;  %v407_v31 = vld [vmem:[#allocation11] sm:$0xff]  ;;  %s321_s13 = sshll.u32 %s786_s9, 4  ;;  %s646_s14 = smov [#allocation13]   ;;  %s322_s13 = int_to_ptr.hbm [resolvable:$true] %s321_s13 }
  0x1b   :  { %265 = vmatpush.bf16.msra.mxu1 %v406_v25  ;;  %303 = vmatpush.bf16.msra.mxu2 %v408_v26  ;;  %v422_v41 = vld [vmem:[#allocation6] ss:$0 sm:$0xff]  ;;  %v423_v44 = vld [vmem:[%s779_s2] ss:$0 sm:$0xff]  ;;  %s332_s5 = sshll.u32 %s646_s14, 4  ;;  %s334_s16 = sshll.u32 %s787_s10, 4  ;;  %s333_s5 = int_to_ptr.vmem [resolvable:$true] %s332_s5  ;;  %s335_s16 = int_to_ptr.hbm [resolvable:$true] %s334_s16 }
  0x1c   :  { %v424_v58 = vld [vmem:[%s781_s4] ss:$0 sm:$0xff]  ;;  %s645_s4 = smov [#allocation12]   ;;  %s647_s9 = smov [#allocation15]  }
  0x1d   :  { %v425_v59 = vld [vmem:[%s783_s6] ss:$0 sm:$0xff]  ;;  %s319_s6 = sshll.u32 %s645_s4, 4  ;;  %s345_s17 = sshll.u32 %s647_s9, 4  ;;  %s320_s6 = int_to_ptr.vmem [resolvable:$true] %s319_s6  ;;  %s346_s17 = int_to_ptr.vmem [resolvable:$true] %s345_s17 }
  0x1e   :  { %227 = vmatpush.bf16.msra.mxu0 %v403_v29  ;;  %s347_s19 = sshll.u32 %s788_s11, 4  ;;  %s348_s19 = int_to_ptr.hbm [resolvable:$true] %s347_s19 }
  0x1f   :  { %v428_v5 = vpop.eup %427  ;;  %266 = vmatpush.bf16.msra.mxu1 %v405_v30  ;;  %304 = vmatpush.bf16.msra.mxu2 %v407_v31 }
  0x20   :  { %v130_v6 = vmul.f32 32.0, %v428_v5  ;;  %vm134_vm1 = vweird.f32 %v428_v5 }
  0x22   :  { %127 = vadd.xlane.f32.xlu0 %v126_v3  ;;  %v131_v7 = vsub.f32 1.0, %v130_v6 }
  0x24   :  { %v132_v8 = vmul.f32 %v428_v5, %v131_v7 }
  0x26   :  { %v133_v9 = vadd.f32 %v428_v5, %v132_v8 }
  0x28   :  { %v135_v10 = vsel %vm134_vm1, %v428_v5, %v133_v9 }
  0x8d   :  { %v125_v11 = vpop.xlane.xlu0 %124 }
  0x8e   :  { %v136_v12 = vmul.f32 %v135_v10, %v125_v11 }
  0x90   :  { %v138_v13 = vsub.f32 %v118_v0, %v136_v12 }
  0x92   :  { %v140_v14 = vmul.f32 %v138_v13, %v138_v13 }
  0x94   :  { %v142_v15 = vsel %vm122_vm0, %v140_v14, 0.0 }
  0x95   :  { %143 = vadd.xlane.f32.xlu1 %v142_v15  ;;  %v128_v16 = vpop.xlane.xlu0 %127 }
  0x96   :  { %v137_v17 = vmul.f32 %v135_v10, %v128_v16 }
  0x98   :  { %v139_v18 = vsub.f32 %v119_v2, %v137_v17  ;;  %v426_v2 = vld [vmem:[%s785_s8] ss:$0 sm:$0xff] }
  0x9a   :  { %v141_v19 = vmul.f32 %v139_v18, %v139_v18 }
  0x9c   :  { %v145_v20 = vsel %vm122_vm0, %v141_v19, 0.0 }
  0x9d   :  { %146 = vadd.xlane.f32.xlu1 %v145_v20 }
 0x108   :  { %v144_v21 = vpop.xlane.xlu1 %143 }
 0x109   :  { %v148_v22 = vmul.f32 %v144_v21, %v135_v10 }
 0x10b   :  { %v150_v23 = vadd.f32 1e-05, %v148_v22 }
 0x10d   :  { %429 = vrsqrt.f32 %v150_v23  ;;  %vm158_vm3 = vweird.f32 %v150_v23 }
 0x110   :  { %v147_v27 = vpop.xlane.xlu1 %146 }
 0x111   :  { %v149_v28 = vmul.f32 %v147_v27, %v135_v10 }
 0x113   :  { %v430_v32 = vpop.eup %429  ;;  %v151_v33 = vadd.f32 1e-05, %v149_v28 }
 0x114   :  { %v153_v34 = vmul.f32 %v430_v32, %v150_v23  ;;  %vm159_vm2 = vweird.f32 %v430_v32 }
 0x115   :  { %431 = vrsqrt.f32 %v151_v33  ;;  %vm160_vm4 = vmor %vm158_vm3, %vm159_vm2  ;;  %vm168_vm7 = vweird.f32 %v151_v33 }
 0x116   :  { %v154_v35 = vmul.f32 %v430_v32, %v153_v34 }
 0x118   :  { %v155_v36 = vmul.f32 0.5, %v154_v35 }
 0x11a   :  { %v156_v37 = vsub.f32 1.5, %v155_v36 }
 0x11b   :  { %v432_v38 = vpop.eup %431 }
 0x11c   :  { %v157_v39 = vmul.f32 %v430_v32, %v156_v37  ;;  %v163_v40 = vmul.f32 %v432_v38, %v151_v33  ;;  %vm169_vm5 = vweird.f32 %v432_v38 }
 0x11d   :  { %vm170_vm8 = vmor %vm168_vm7, %vm169_vm5 }
 0x11e   :  { %v161_v42 = vsel %vm160_vm4, %v430_v32, %v157_v39  ;;  %v164_v43 = vmul.f32 %v432_v38, %v163_v40 }
 0x11f   :  { %v172_v45 = vmul.f32 %v161_v42, %v138_v13 }
 0x120   :  { %v165_v46 = vmul.f32 0.5, %v164_v43 }
 0x121   :  { %v177_v47 = vmul.f32 %v422_v41, %v172_v45 }
 0x122   :  { %v166_v48 = vsub.f32 1.5, %v165_v46 }
 0x123   :  { %v182_v49 = vadd.f32 %v423_v44, %v177_v47 }
 0x124   :  { %v167_v50 = vmul.f32 %v432_v38, %v166_v48 }
 0x125   :  { %v184_v51 = vpack.c.bf16 %v182_v49, %v182_v49 }
 0x126   :  { %v171_v52 = vsel %vm170_vm8, %v432_v38, %v167_v50 }
 0x127   :  { %187 = vst.msk [vmem:[#allocation2] sm:$0xf] %vm186_vm6, %v184_v51  ;;  %v173_v53 = vmul.f32 %v171_v52, %v139_v18 }
 0x129   :  { %v178_v54 = vmul.f32 %v422_v41, %v173_v53 }
 0x12b   :  { %v183_v55 = vadd.f32 %v423_v44, %v178_v54 }
 0x12d   :  { %v185_v56 = vpack.c.bf16 %v183_v55, %v183_v55 }
 0x12f   :  { %188 = vst.msk [vmem:[#allocation2 + $0x4] sm:$0xf] %vm186_vm6, %v185_v56 }
 0x136   :  { %v402_v57 = vld [vmem:[#allocation2] sm:$0xff] }
 0x137   :  { %383 = vmatmul.msk.bf16.vlgmr.msra.gmra.mxu0 %vm122_vm0, %v402_v57  ;;  %392 = vmatmul.msk.bf16.vlgmr.msra.gmra.mxu1 %vm122_vm0, %v402_v57 }
 0x138   :  { %401 = vmatmul.msk.bf16.vlgmr.msra.gmra.mxu2 %vm122_vm0, %v402_v57 }
 0x1b4   :  { %v229_v60 = vpop.f32.mrf.mxu0  ;;  %v268_v61 = vpop.f32.mrf.mxu1 }
 0x1b5   :  { %v230_v62 = vadd.f32 %v424_v58, %v229_v60  ;;  %v269_v63 = vadd.f32 %v425_v59, %v268_v61 }
 0x1b7   :  { %v234_v0 = vpack.c.bf16 %v230_v62, %v230_v62  ;;  %v273_v1 = vpack.c.bf16 %v269_v63, %v269_v63 }
 0x1b9   :  { %237 = vst.msk [vmem:[#allocation12] sm:$0xf] %vm186_vm6, %v234_v0 }
 0x1ba   :  { %275 = vst.msk [vmem:[#allocation13] sm:$0xf] %vm186_vm6, %v273_v1 }
 0x1bb   :  { %v306_v3 = vpop.f32.mrf.mxu2 }
 0x1bc   :  { %v307_v4 = vadd.f32 %v426_v2, %v306_v3  ;;  %v231_v5 = vpop.f32.mrf.mxu0  ;;  %v270_v6 = vpop.f32.mrf.mxu1 }
 0x1bd   :  { %v232_v7 = vadd.f32 %v424_v58, %v231_v5  ;;  %v271_v8 = vadd.f32 %v425_v59, %v270_v6 }
 0x1be   :  { %v311_v9 = vpack.c.bf16 %v307_v4, %v307_v4 }
 0x1bf   :  { %v235_v10 = vpack.c.bf16 %v232_v7, %v232_v7  ;;  %v274_v11 = vpack.c.bf16 %v271_v8, %v271_v8 }
 0x1c0   :  { %313 = vst.msk [vmem:[#allocation15] sm:$0xf] %vm186_vm6, %v311_v9 }
 0x1c1   :  { %238 = vst.msk [vmem:[#allocation12 + $0x4] sm:$0xf] %vm186_vm6, %v235_v10 }
 0x1c2   :  { %276 = vst.msk [vmem:[#allocation13 + $0x4] sm:$0xf] %vm186_vm6, %v274_v11  ;;  %327 = dma.vmem_to_hbm [thread:$0]  %s320_s6, 128, %s322_s13, [#allocation5], %s637_s1, %s637_s1, %s638_s30  }
 0x1c3   :  { %v308_v12 = vpop.f32.mrf.mxu2  ;;  %340 = dma.vmem_to_hbm [thread:$0]  %s333_s5, 128, %s335_s16, [#allocation14], %s637_s1, %s637_s1, %s638_s30  }
 0x1c4   :  { %v309_v13 = vadd.f32 %v426_v2, %v308_v12 }
 0x1c6   :  { %v312_v14 = vpack.c.bf16 %v309_v13, %v309_v13 }
 0x1c8   :  { %314 = vst.msk [vmem:[#allocation15 + $0x4] sm:$0xf] %vm186_vm6, %v312_v14 }
 0x1c9   :  { %353 = dma.vmem_to_hbm [thread:$0]  %s346_s17, 128, %s348_s19, [#allocation14], %s637_s1, %s637_s1, %s638_s30  }
 0x1ca   :  { %631 = dma.done.wait [#allocation5], 128  }
 0x1cb   :  { %632 = vsyncadd [#allocation5], 4294967168 }
 0x1cc   :  { %633 = dma.done.wait [#allocation14], 256  }
 0x1cd   :  { %634 = vsyncadd [#allocation14], 4294967040 }
 0x1ce   :  { %366 = vsyncpa [#allocation4], 1 }
 0x1cf   :  { %367 = vsyncpa [#allocation7], 1 }
 0x1d0   :  { %368 = vsyncpa [#allocation10], 1 }
 0x1d1   :  { %369 = vsyncpa [#allocation5], 1 }
 0x1d2   :  { %370 = vsyncpa [#allocation14], 1 }

</bundles_post_ra>
